<compile_context>
chip_gen: v7x
topology: tpu7x:2x2x1
jax: 0.10.0
libtpu: 0.0.40
codegen_flags: <defaults>
</compile_context>

<pallas_src>
import functools

import jax
import jax.numpy as jnp
from jax.experimental import pallas as pl
from jax.experimental.pallas import tpu as pltpu

HIDDEN = 400
LATENT = 20


def _round_up(n, m):
    return (n + m - 1) // m * m


# ----------------------------------------------------------------------------
# kernel
# ----------------------------------------------------------------------------
def cvae_kernel(x_ref, c_ref, eps_ref,
                w1x_ref, w1c_ref, b1_ref,
                w2_ref, b2_ref,
                w3z_ref, w3c_ref, b3_ref,
                w4_ref, b4_ref,
                recon_ref, muvar_ref, *, latent, off):
    """One batch tile per grid step.

    x_ref    : (TB, F)        f32   raw features
    c_ref    : (TB, C)        f32   raw class vector
    eps_ref  : (TB, L)        f32   N(0,1) noise
    w1x/w1c  : (F,H)/(C,H)    bf16  fc1 split over the [x|c] concat
    b1       : (1, H)         f32
    w2/b2    : (H, ZP)/(1,ZP)       fused fc21|fc22: mu cols [0,L), logvar cols
                                    [off, off+L), zeros elsewhere
    w3z/w3c  : (L,H)/(C,H)    bf16  fc3 split over the [z|c] concat
    w4/b4    : (H, FP)/(1,FP)       fc4 (zero-padded to lane-dense FP)
    recon    : (TB, FP)       f32   sigmoid(fc4(...)), valid cols [0, F)
    muvar    : (TB, ZP)       f32   packed [mu | logvar] slab
    """
    f32 = jnp.float32
    bf16 = jnp.bfloat16

    xb = x_ref[...].astype(bf16)
    cb = c_ref[...].astype(bf16)

    # ---- encode: h1 = ELU(fc1([x, c])) — concat realized as two matmuls -----
    h1 = (jnp.dot(xb, w1x_ref[...], preferred_element_type=f32)
          + jnp.dot(cb, w1c_ref[...], preferred_element_type=f32)
          + b1_ref[...])
    # ELU(alpha=1); clamp arg so exp never sees large positives (no inf filler).
    h1 = jnp.where(h1 > 0, h1, jnp.exp(jnp.minimum(h1, 0.0)) - 1.0)

    # ---- fused fc21|fc22 head: one lane-dense (TB, 128) matmul --------------
    muvar = (jnp.dot(h1.astype(bf16), w2_ref[...],
                     preferred_element_type=f32) + b2_ref[...])
    muvar_ref[...] = muvar

    mu = muvar[:, :latent]
    logvar = muvar[:, off:off + latent]

    # ---- reparameterize: z = mu + eps * exp(0.5 * logvar) -------------------
    z = mu + eps_ref[...] * jnp.exp(0.5 * logvar)

    # ---- decode: sigmoid(fc4(ELU(fc3([z, c])))) — concat as two matmuls -----
    h3 = (jnp.dot(z.astype(bf16), w3z_ref[...], preferred_element_type=f32)
          + jnp.dot(cb, w3c_ref[...], preferred_element_type=f32)
          + b3_ref[...])
    h3 = jnp.where(h3 > 0, h3, jnp.exp(jnp.minimum(h3, 0.0)) - 1.0)

    logits = (jnp.dot(h3.astype(bf16), w4_ref[...],
                      preferred_element_type=f32) + b4_ref[...])
    # sigmoid(x) == 0.5 * tanh(0.5 x) + 0.5  (tanh runs on the EUP slot)
    recon_ref[...] = 0.5 * jnp.tanh(0.5 * logits) + 0.5


# ----------------------------------------------------------------------------
# wrapper
# ----------------------------------------------------------------------------
def cvae_forward(x, c, eps, packed, feature_size, class_size, latent_size):
    B = x.shape[0]
    H, ZP, OFF, FP = packed["dims"]
    F, C, L = feature_size, class_size, latent_size

    # Batch tile: large tiles amortize the ~0.35us per-grid-step overhead; keep
    # the grid length >= 2 when the batch allows it so v7x can shard the
    # "parallel" axis across its 2 TensorCores.  Cap at 1024 rows (working set
    # stays well inside scoped VMEM with the 32 MiB limit below).
    B8 = _round_up(max(B, 1), 8)
    if B8 >= 16:
        TB = min(1024, _round_up(B8 // 2, 8))
    else:
        TB = B8
    Bp = _round_up(B8, TB)

    def pad_rows(a):
        return a if a.shape[0] == Bp else jnp.pad(a, ((0, Bp - a.shape[0]), (0, 0)))

    xp, cp, ep = pad_rows(x), pad_rows(c), pad_rows(eps)

    grid = (Bp // TB,)
    batch_spec = lambda width: pl.BlockSpec((TB, width), lambda i: (i, 0))
    resident = lambda arr: pl.BlockSpec(arr.shape, lambda i: (0, 0))

    wnames = ("w1x", "w1c", "b1", "w2", "b2", "w3z", "w3c", "b3", "w4", "b4")
    weights = [packed[k] for k in wnames]

    flops = 2 * Bp * (F * H + C * H + H * ZP + L * H + C * H + H * FP)
    transcendentals = Bp * (2 * H + L + FP)
    bytes_accessed = ((xp.size + cp.size + ep.size) * 4
                      + sum(int(w.size) * w.dtype.itemsize for w in weights)
                      + Bp * (FP + ZP) * 4)

    kernel = functools.partial(cvae_kernel, latent=L, off=OFF)
    recon_p, muvar_p = pl.pallas_call(
        kernel,
        out_shape=(jax.ShapeDtypeStruct((Bp, FP), jnp.float32),
                   jax.ShapeDtypeStruct((Bp, ZP), jnp.float32)),
        grid=grid,
        in_specs=[batch_spec(F), batch_spec(C), batch_spec(L)]
                 + [resident(w) for w in weights],
        out_specs=(batch_spec(FP), batch_spec(ZP)),
        compiler_params=pltpu.CompilerParams(
            dimension_semantics=("parallel",),
            vmem_limit_bytes=32 * 1024 * 1024),
        cost_estimate=pl.CostEstimate(flops=int(flops),
                                      transcendentals=int(transcendentals),
                                      bytes_accessed=int(bytes_accessed)),
    )(xp, cp, ep, *weights)

    recon = recon_p[:B, :F]
    mu = muvar_p[:B, :L]
    logvar = muvar_p[:B, OFF:OFF + L]
    return recon, mu, logvar


# ----------------------------------------------------------------------------
# parameters (PyTorch-style init, stored transposed (in, out)) + packing
# ----------------------------------------------------------------------------
def init_params(key, feature_size, class_size, latent_size, hidden=HIDDEN):
    def linear(k, fan_in, fan_out):
        kw, kb = jax.random.split(k)
        bound = 1.0 / float(fan_in) ** 0.5
        w = jax.random.uniform(kw, (fan_in, fan_out), jnp.float32, -bound, bound)
        b = jax.random.uniform(kb, (1, fan_out), jnp.float32, -bound, bound)
        return w, b

    k1, k21, k22, k3, k4 = jax.random.split(key, 5)
    w1, b1 = linear(k1, feature_size + class_size, hidden)
    w21, b21 = linear(k21, hidden, latent_size)
    w22, b22 = linear(k22, hidden, latent_size)
    w3, b3 = linear(k3, latent_size + class_size, hidden)
    w4, b4 = linear(k4, hidden, feature_size)
    return dict(w1=w1, b1=b1, w21=w21, b21=b21, w22=w22, b22=b22,
                w3=w3, b3=b3, w4=w4, b4=b4)


def pack_params(p, feature_size, class_size, latent_size, hidden=HIDDEN):
    """Split fc1/fc3 over their concats, fuse fc21|fc22 into one 128-lane head,
    zero-pad to lane-dense widths, and cast weights to bf16 (biases stay f32)."""
    F, C, L = feature_size, class_size, latent_size
    H = _round_up(hidden, 128)                          # 512
    OFF = max(64, _round_up(L, 64))                     # lane offset of logvar
    ZP = _round_up(OFF + L, 128)                        # packed [mu|logvar] width
    FP = _round_up(F, 128)

    f32, bf = jnp.float32, jnp.bfloat16

    w1x = jnp.zeros((F, H), f32).at[:, :hidden].set(p["w1"][:F]).astype(bf)
    w1c = jnp.zeros((C, H), f32).at[:, :hidden].set(p["w1"][F:F + C]).astype(bf)
    b1 = jnp.zeros((1, H), f32).at[:, :hidden].set(p["b1"])

    w2 = jnp.zeros((H, ZP), f32)
    w2 = w2.at[:hidden, :L].set(p["w21"]).at[:hidden, OFF:OFF + L].set(p["w22"])
    b2 = jnp.zeros((1, ZP), f32).at[:, :L].set(p["b21"]).at[:, OFF:OFF + L].set(p["b22"])

    w3z = jnp.zeros((L, H), f32).at[:, :hidden].set(p["w3"][:L]).astype(bf)
    w3c = jnp.zeros((C, H), f32).at[:, :hidden].set(p["w3"][L:L + C]).astype(bf)
    b3 = jnp.zeros((1, H), f32).at[:, :hidden].set(p["b3"])

    w4 = jnp.zeros((H, FP), f32).at[:hidden, :F].set(p["w4"]).astype(bf)
    b4 = jnp.zeros((1, FP), f32).at[:, :F].set(p["b4"])

    return dict(w1x=w1x, w1c=w1c, b1=b1, w2=w2.astype(bf), b2=b2,
                w3z=w3z, w3c=w3c, b3=b3, w4=w4, b4=b4,
                dims=(H, ZP, OFF, FP))


# ----------------------------------------------------------------------------
# plain-JAX reference (mirrors the PyTorch forward with the same bf16 dots)
# ----------------------------------------------------------------------------
def cvae_reference(x, c, eps, p):
    bf = lambda a: a.astype(jnp.bfloat16)
    dot = functools.partial(jnp.dot, preferred_element_type=jnp.float32)
    elu = lambda h: jnp.where(h > 0, h, jnp.exp(jnp.minimum(h, 0.0)) - 1.0)

    xc = jnp.concatenate([x, c], axis=1)
    h1 = elu(dot(bf(xc), bf(p["w1"])) + p["b1"])
    mu = dot(bf(h1), bf(p["w21"])) + p["b21"]
    logvar = dot(bf(h1), bf(p["w22"])) + p["b22"]
    z = mu + eps * jnp.exp(0.5 * logvar)
    zc = jnp.concatenate([z, c], axis=1)
    h3 = elu(dot(bf(zc), bf(p["w3"])) + p["b3"])
    recon = jax.nn.sigmoid(dot(bf(h3), bf(p["w4"])) + p["b4"])
    return recon, mu, logvar


if __name__ == "__main__":
    B, FEATURE, CLASS = 8, 32, 8

    key = jax.random.PRNGKey(0)
    kx, kc, keps, kp = jax.random.split(key, 4)
    x = jax.nn.sigmoid(jax.random.normal(kx, (B, FEATURE), jnp.float32))
    c = jax.nn.one_hot(jax.random.randint(kc, (B,), 0, CLASS), CLASS,
                       dtype=jnp.float32)
    # eps supplied explicitly (PyTorch uses torch.randn_like inside forward).
    eps = jax.random.normal(keps, (B, LATENT), jnp.float32)

    params = init_params(kp, FEATURE, CLASS, LATENT)
    packed = pack_params(params, FEATURE, CLASS, LATENT)

    fwd = jax.jit(lambda x_, c_, e_: cvae_forward(x_, c_, e_, packed,
                                                  FEATURE, CLASS, LATENT))
    recon, mu, logvar = jax.block_until_ready(fwd(x, c, eps))

    r_recon, r_mu, r_logvar = cvae_reference(x, c, eps, params)
    assert jnp.allclose(mu, r_mu, atol=1e-4, rtol=1e-4), "mu mismatch"
    assert jnp.allclose(logvar, r_logvar, atol=1e-4, rtol=1e-4), "logvar mismatch"
    assert jnp.allclose(recon, r_recon, atol=1e-4, rtol=1e-4), "recon mismatch"

    print("KERNEL_OK")
</pallas_src>

<mosaic_0001>
module attributes {stable_mosaic.version = 11 : i64} {
  func.func @cvae_kernel(%arg0: i32, %arg1: memref<8x32xf32, #tpu.memory_space<vmem>>, %arg2: memref<8x8xf32, #tpu.memory_space<vmem>>, %arg3: memref<8x20xf32, #tpu.memory_space<vmem>>, %arg4: memref<32x512xbf16, #tpu.memory_space<vmem>>, %arg5: memref<8x512xbf16, #tpu.memory_space<vmem>>, %arg6: memref<1x512xf32, #tpu.memory_space<vmem>>, %arg7: memref<512x128xbf16, #tpu.memory_space<vmem>>, %arg8: memref<1x128xf32, #tpu.memory_space<vmem>>, %arg9: memref<20x512xbf16, #tpu.memory_space<vmem>>, %arg10: memref<8x512xbf16, #tpu.memory_space<vmem>>, %arg11: memref<1x512xf32, #tpu.memory_space<vmem>>, %arg12: memref<512x128xbf16, #tpu.memory_space<vmem>>, %arg13: memref<1x128xf32, #tpu.memory_space<vmem>>, %arg14: memref<8x128xf32, #tpu.memory_space<vmem>>, %arg15: memref<8x128xf32, #tpu.memory_space<vmem>>) attributes {dimension_semantics = [#tpu.dimension_semantics<parallel>], iteration_bounds = array<i64: 1>, scalar_prefetch = 0 : i64, scratch_operands = 0 : i64, tpu.core_type = #tpu.core_type<tc>, window_params = [{transform_indices = @transform_0, window_bounds = array<i64: 8, 32>}, {transform_indices = @transform_1, window_bounds = array<i64: 8, 8>}, {transform_indices = @transform_2, window_bounds = array<i64: 8, 20>}, {pipeline_mode = #tpu.pipeline_mode<synchronous>, transform_indices = @transform_3, window_bounds = array<i64: 32, 512>}, {pipeline_mode = #tpu.pipeline_mode<synchronous>, transform_indices = @transform_4, window_bounds = array<i64: 8, 512>}, {pipeline_mode = #tpu.pipeline_mode<synchronous>, transform_indices = @transform_5, window_bounds = array<i64: 1, 512>}, {pipeline_mode = #tpu.pipeline_mode<synchronous>, transform_indices = @transform_6, window_bounds = array<i64: 512, 128>}, {pipeline_mode = #tpu.pipeline_mode<synchronous>, transform_indices = @transform_7, window_bounds = array<i64: 1, 128>}, {pipeline_mode = #tpu.pipeline_mode<synchronous>, transform_indices = @transform_8, window_bounds = array<i64: 20, 512>}, {pipeline_mode = #tpu.pipeline_mode<synchronous>, transform_indices = @transform_9, window_bounds = array<i64: 8, 512>}, {pipeline_mode = #tpu.pipeline_mode<synchronous>, transform_indices = @transform_10, window_bounds = array<i64: 1, 512>}, {pipeline_mode = #tpu.pipeline_mode<synchronous>, transform_indices = @transform_11, window_bounds = array<i64: 512, 128>}, {pipeline_mode = #tpu.pipeline_mode<synchronous>, transform_indices = @transform_12, window_bounds = array<i64: 1, 128>}, {transform_indices = @transform_13, window_bounds = array<i64: 8, 128>}, {transform_indices = @transform_14, window_bounds = array<i64: 8, 128>}]} {
    %c0 = arith.constant 0 : index
    %c0_0 = arith.constant 0 : index
    %0 = vector.load %arg1[%c0, %c0_0] : memref<8x32xf32, #tpu.memory_space<vmem>>, vector<8x32xf32>
    %1 = arith.truncf %0 : vector<8x32xf32> to vector<8x32xbf16>
    %c0_1 = arith.constant 0 : index
    %c0_2 = arith.constant 0 : index
    %2 = vector.load %arg2[%c0_1, %c0_2] : memref<8x8xf32, #tpu.memory_space<vmem>>, vector<8x8xf32>
    %3 = arith.truncf %2 : vector<8x8xf32> to vector<8x8xbf16>
    %c0_3 = arith.constant 0 : index
    %c0_4 = arith.constant 0 : index
    %4 = vector.load %arg4[%c0_3, %c0_4] : memref<32x512xbf16, #tpu.memory_space<vmem>>, vector<32x512xbf16>
    %cst = arith.constant dense<0.000000e+00> : vector<8x512xf32>
    %5 = tpu.matmul %1, %4, %cst {dimension_numbers = #tpu.dot_dimension_numbers<[1], [0], [0], [1], [0, 0, 1, 1], [], []>} : vector<8x32xbf16>, vector<32x512xbf16>, vector<8x512xf32> -> vector<8x512xf32>
    %c0_5 = arith.constant 0 : index
    %c0_6 = arith.constant 0 : index
    %6 = vector.load %arg5[%c0_5, %c0_6] : memref<8x512xbf16, #tpu.memory_space<vmem>>, vector<8x512xbf16>
    %cst_7 = arith.constant dense<0.000000e+00> : vector<8x512xf32>
    %7 = tpu.matmul %3, %6, %cst_7 {dimension_numbers = #tpu.dot_dimension_numbers<[1], [0], [0], [1], [0, 0, 1, 1], [], []>} : vector<8x8xbf16>, vector<8x512xbf16>, vector<8x512xf32> -> vector<8x512xf32>
    %8 = arith.addf %5, %7 : vector<8x512xf32>
    %c0_8 = arith.constant 0 : index
    %c0_9 = arith.constant 0 : index
    %9 = vector.load %arg6[%c0_8, %c0_9] : memref<1x512xf32, #tpu.memory_space<vmem>>, vector<1x512xf32>
    %10 = vector.broadcast %9 : vector<1x512xf32> to vector<8x512xf32>
    %11 = arith.addf %8, %10 : vector<8x512xf32>
    %cst_10 = arith.constant 0.000000e+00 : f32
    %12 = vector.broadcast %cst_10 : f32 to vector<8x512xf32>
    %13 = arith.cmpf ogt, %11, %12 : vector<8x512xf32>
    %cst_11 = arith.constant 0.000000e+00 : f32
    %14 = vector.broadcast %cst_11 : f32 to vector<8x512xf32>
    %15 = arith.minimumf %11, %14 : vector<8x512xf32>
    %16 = math.exp %15 : vector<8x512xf32>
    %cst_12 = arith.constant 1.000000e+00 : f32
    %17 = vector.broadcast %cst_12 : f32 to vector<8x512xf32>
    %18 = arith.subf %16, %17 : vector<8x512xf32>
    %19 = arith.select %13, %11, %18 : vector<8x512xi1>, vector<8x512xf32>
    %20 = arith.truncf %19 : vector<8x512xf32> to vector<8x512xbf16>
    %c0_13 = arith.constant 0 : index
    %c0_14 = arith.constant 0 : index
    %21 = vector.load %arg7[%c0_13, %c0_14] : memref<512x128xbf16, #tpu.memory_space<vmem>>, vector<512x128xbf16>
    %cst_15 = arith.constant dense<0.000000e+00> : vector<8x128xf32>
    %22 = tpu.matmul %20, %21, %cst_15 {dimension_numbers = #tpu.dot_dimension_numbers<[1], [0], [0], [1], [0, 0, 1, 1], [], []>} : vector<8x512xbf16>, vector<512x128xbf16>, vector<8x128xf32> -> vector<8x128xf32>
    %c0_16 = arith.constant 0 : index
    %c0_17 = arith.constant 0 : index
    %23 = vector.load %arg8[%c0_16, %c0_17] : memref<1x128xf32, #tpu.memory_space<vmem>>, vector<1x128xf32>
    %24 = vector.broadcast %23 : vector<1x128xf32> to vector<8x128xf32>
    %25 = arith.addf %22, %24 : vector<8x128xf32>
    %c0_18 = arith.constant 0 : index
    %c0_19 = arith.constant 0 : index
    %26 = vector.load %arg15[%c0_18, %c0_19] : memref<8x128xf32, #tpu.memory_space<vmem>>, vector<8x128xf32>
    tpu.vector_store %arg15[%c0_18, %c0_19], %25 {strides = array<i32>} : memref<8x128xf32, #tpu.memory_space<vmem>>, vector<8x128xf32>,
    %27 = vector.extract_strided_slice %25 {offsets = [0, 0], sizes = [8, 20], strides = [1, 1]} : vector<8x128xf32> to vector<8x20xf32>
    %28 = vector.extract_strided_slice %25 {offsets = [0, 64], sizes = [8, 20], strides = [1, 1]} : vector<8x128xf32> to vector<8x20xf32>
    %c0_20 = arith.constant 0 : index
    %c0_21 = arith.constant 0 : index
    %29 = vector.load %arg3[%c0_20, %c0_21] : memref<8x20xf32, #tpu.memory_space<vmem>>, vector<8x20xf32>
    %cst_22 = arith.constant 5.000000e-01 : f32
    %30 = vector.broadcast %cst_22 : f32 to vector<8x20xf32>
    %31 = arith.mulf %30, %28 : vector<8x20xf32>
    %32 = math.exp %31 : vector<8x20xf32>
    %33 = arith.mulf %29, %32 : vector<8x20xf32>
    %34 = arith.addf %27, %33 : vector<8x20xf32>
    %35 = arith.truncf %34 : vector<8x20xf32> to vector<8x20xbf16>
    %c0_23 = arith.constant 0 : index
    %c0_24 = arith.constant 0 : index
    %36 = vector.load %arg9[%c0_23, %c0_24] : memref<20x512xbf16, #tpu.memory_space<vmem>>, vector<20x512xbf16>
    %cst_25 = arith.constant dense<0.000000e+00> : vector<8x512xf32>
    %37 = tpu.matmul %35, %36, %cst_25 {dimension_numbers = #tpu.dot_dimension_numbers<[1], [0], [0], [1], [0, 0, 1, 1], [], []>} : vector<8x20xbf16>, vector<20x512xbf16>, vector<8x512xf32> -> vector<8x512xf32>
    %c0_26 = arith.constant 0 : index
    %c0_27 = arith.constant 0 : index
    %38 = vector.load %arg10[%c0_26, %c0_27] : memref<8x512xbf16, #tpu.memory_space<vmem>>, vector<8x512xbf16>
    %cst_28 = arith.constant dense<0.000000e+00> : vector<8x512xf32>
    %39 = tpu.matmul %3, %38, %cst_28 {dimension_numbers = #tpu.dot_dimension_numbers<[1], [0], [0], [1], [0, 0, 1, 1], [], []>} : vector<8x8xbf16>, vector<8x512xbf16>, vector<8x512xf32> -> vector<8x512xf32>
    %40 = arith.addf %37, %39 : vector<8x512xf32>
    %c0_29 = arith.constant 0 : index
    %c0_30 = arith.constant 0 : index
    %41 = vector.load %arg11[%c0_29, %c0_30] : memref<1x512xf32, #tpu.memory_space<vmem>>, vector<1x512xf32>
    %42 = vector.broadcast %41 : vector<1x512xf32> to vector<8x512xf32>
    %43 = arith.addf %40, %42 : vector<8x512xf32>
    %cst_31 = arith.constant 0.000000e+00 : f32
    %44 = vector.broadcast %cst_31 : f32 to vector<8x512xf32>
    %45 = arith.cmpf ogt, %43, %44 : vector<8x512xf32>
    %cst_32 = arith.constant 0.000000e+00 : f32
    %46 = vector.broadcast %cst_32 : f32 to vector<8x512xf32>
    %47 = arith.minimumf %43, %46 : vector<8x512xf32>
    %48 = math.exp %47 : vector<8x512xf32>
    %cst_33 = arith.constant 1.000000e+00 : f32
    %49 = vector.broadcast %cst_33 : f32 to vector<8x512xf32>
    %50 = arith.subf %48, %49 : vector<8x512xf32>
    %51 = arith.select %45, %43, %50 : vector<8x512xi1>, vector<8x512xf32>
    %52 = arith.truncf %51 : vector<8x512xf32> to vector<8x512xbf16>
    %c0_34 = arith.constant 0 : index
    %c0_35 = arith.constant 0 : index
    %53 = vector.load %arg12[%c0_34, %c0_35] : memref<512x128xbf16, #tpu.memory_space<vmem>>, vector<512x128xbf16>
    %cst_36 = arith.constant dense<0.000000e+00> : vector<8x128xf32>
    %54 = tpu.matmul %52, %53, %cst_36 {dimension_numbers = #tpu.dot_dimension_numbers<[1], [0], [0], [1], [0, 0, 1, 1], [], []>} : vector<8x512xbf16>, vector<512x128xbf16>, vector<8x128xf32> -> vector<8x128xf32>
    %c0_37 = arith.constant 0 : index
    %c0_38 = arith.constant 0 : index
    %55 = vector.load %arg13[%c0_37, %c0_38] : memref<1x128xf32, #tpu.memory_space<vmem>>, vector<1x128xf32>
    %56 = vector.broadcast %55 : vector<1x128xf32> to vector<8x128xf32>
    %57 = arith.addf %54, %56 : vector<8x128xf32>
    %cst_39 = arith.constant 5.000000e-01 : f32
    %58 = vector.broadcast %cst_39 : f32 to vector<8x128xf32>
    %59 = arith.mulf %58, %57 : vector<8x128xf32>
    %60 = math.tanh %59 : vector<8x128xf32>
    %cst_40 = arith.constant 5.000000e-01 : f32
    %61 = vector.broadcast %cst_40 : f32 to vector<8x128xf32>
    %62 = arith.mulf %61, %60 : vector<8x128xf32>
    %cst_41 = arith.constant 5.000000e-01 : f32
    %63 = vector.broadcast %cst_41 : f32 to vector<8x128xf32>
    %64 = arith.addf %62, %63 : vector<8x128xf32>
    %c0_42 = arith.constant 0 : index
    %c0_43 = arith.constant 0 : index
    %65 = vector.load %arg14[%c0_42, %c0_43] : memref<8x128xf32, #tpu.memory_space<vmem>>, vector<8x128xf32>
    tpu.vector_store %arg14[%c0_42, %c0_43], %64 {strides = array<i32>} : memref<8x128xf32, #tpu.memory_space<vmem>>, vector<8x128xf32>,
    return
  }
  func.func @transform_0(%arg0: i32) -> (i32, i32) {
    %c0_i32 = arith.constant 0 : i32
    %c0_i32_0 = arith.constant 0 : i32
    return %arg0, %c0_i32 : i32, i32
  }
  func.func @transform_1(%arg0: i32) -> (i32, i32) {
    %c0_i32 = arith.constant 0 : i32
    %c0_i32_0 = arith.constant 0 : i32
    return %arg0, %c0_i32 : i32, i32
  }
  func.func @transform_2(%arg0: i32) -> (i32, i32) {
    %c0_i32 = arith.constant 0 : i32
    %c0_i32_0 = arith.constant 0 : i32
    return %arg0, %c0_i32 : i32, i32
  }
  func.func @transform_3(%arg0: i32) -> (i32, i32) {
    %c0_i32 = arith.constant 0 : i32
    %c0_i32_0 = arith.constant 0 : i32
    %c0_i32_1 = arith.constant 0 : i32
    return %c0_i32, %c0_i32_0 : i32, i32
  }
  func.func @transform_4(%arg0: i32) -> (i32, i32) {
    %c0_i32 = arith.constant 0 : i32
    %c0_i32_0 = arith.constant 0 : i32
    %c0_i32_1 = arith.constant 0 : i32
    return %c0_i32, %c0_i32_0 : i32, i32
  }
  func.func @transform_5(%arg0: i32) -> (i32, i32) {
    %c0_i32 = arith.constant 0 : i32
    %c0_i32_0 = arith.constant 0 : i32
    %c0_i32_1 = arith.constant 0 : i32
    return %c0_i32, %c0_i32_0 : i32, i32
  }
  func.func @transform_6(%arg0: i32) -> (i32, i32) {
    %c0_i32 = arith.constant 0 : i32
    %c0_i32_0 = arith.constant 0 : i32
    %c0_i32_1 = arith.constant 0 : i32
    return %c0_i32, %c0_i32_0 : i32, i32
  }
  func.func @transform_7(%arg0: i32) -> (i32, i32) {
    %c0_i32 = arith.constant 0 : i32
    %c0_i32_0 = arith.constant 0 : i32
    %c0_i32_1 = arith.constant 0 : i32
    return %c0_i32, %c0_i32_0 : i32, i32
  }
  func.func @transform_8(%arg0: i32) -> (i32, i32) {
    %c0_i32 = arith.constant 0 : i32
    %c0_i32_0 = arith.constant 0 : i32
    %c0_i32_1 = arith.constant 0 : i32
    return %c0_i32, %c0_i32_0 : i32, i32
  }
  func.func @transform_9(%arg0: i32) -> (i32, i32) {
    %c0_i32 = arith.constant 0 : i32
    %c0_i32_0 = arith.constant 0 : i32
    %c0_i32_1 = arith.constant 0 : i32
    return %c0_i32, %c0_i32_0 : i32, i32
  }
  func.func @transform_10(%arg0: i32) -> (i32, i32) {
    %c0_i32 = arith.constant 0 : i32
    %c0_i32_0 = arith.constant 0 : i32
    %c0_i32_1 = arith.constant 0 : i32
    return %c0_i32, %c0_i32_0 : i32, i32
  }
  func.func @transform_11(%arg0: i32) -> (i32, i32) {
    %c0_i32 = arith.constant 0 : i32
    %c0_i32_0 = arith.constant 0 : i32
    %c0_i32_1 = arith.constant 0 : i32
    return %c0_i32, %c0_i32_0 : i32, i32
  }
  func.func @transform_12(%arg0: i32) -> (i32, i32) {
    %c0_i32 = arith.constant 0 : i32
    %c0_i32_0 = arith.constant 0 : i32
    %c0_i32_1 = arith.constant 0 : i32
    return %c0_i32, %c0_i32_0 : i32, i32
  }
  func.func @transform_13(%arg0: i32) -> (i32, i32) {
    %c0_i32 = arith.constant 0 : i32
    %c0_i32_0 = arith.constant 0 : i32
    return %arg0, %c0_i32 : i32, i32
  }
  func.func @transform_14(%arg0: i32) -> (i32, i32) {
    %c0_i32 = arith.constant 0 : i32
    %c0_i32_0 = arith.constant 0 : i32
    return %arg0, %c0_i32 : i32, i32
  }
}

</mosaic_0001>

<bundles_post_ra>
// kernel: _lambda_.1
= control target key start
LH: loop header
LB: loop body
LE: loop exit
PB: predicated region body
PF: predicated region fallthrough
CT: control target
= control target key end

     0   :  { %20 = vsyncpa [#allocation3], 0  ;;  %s2049_s0 = inlined_call_operand.vmem [shape: f32[8,32], index: 0, kind: input, shape index: {}]   ;;  %s2050_s1 = inlined_call_operand.vmem [shape: f32[8,8], index: 1, kind: input, shape index: {}]   ;;  %s2051_s2 = inlined_call_operand.vmem [shape: f32[8,20], index: 2, kind: input, shape index: {}]   ;;  %s2052_s3 = inlined_call_operand.vmem [shape: bf16[32,512], index: 3, kind: input, shape index: {}]   ;;  %s2053_s4 = inlined_call_operand.vmem [shape: bf16[8,512], index: 4, kind: input, shape index: {}]   ;;  %s2054_s5 = inlined_call_operand.vmem [shape: f32[1,512], index: 5, kind: input, shape index: {}]   ;;  %s2055_s6 = inlined_call_operand.hbm [shape: bf16[512,128], index: 6, kind: input, shape index: {}]   ;;  %s2056_s7 = inlined_call_operand.vmem [shape: f32[1,128], index: 7, kind: input, shape index: {}]   ;;  %s2057_s8 = inlined_call_operand.vmem [shape: bf16[20,512], index: 8, kind: input, shape index: {}]   ;;  %s2058_s9 = inlined_call_operand.vmem [shape: bf16[8,512], index: 9, kind: input, shape index: {}]   ;;  %s2059_s10 = inlined_call_operand.vmem [shape: f32[1,512], index: 10, kind: input, shape index: {}]   ;;  %s2060_s11 = inlined_call_operand.hbm [shape: bf16[512,128], index: 11, kind: input, shape index: {}]   ;;  %s2061_s12 = inlined_call_operand.vmem [shape: f32[1,128], index: 12, kind: input, shape index: {}]   ;;  %s2062_s13 = inlined_call_operand.hbm [shape: f32[8,128], index: 13, kind: output, shape index: {0}]   ;;  %s2063_s14 = inlined_call_operand.vmem [shape: f32[8,128], index: 14, kind: output, shape index: {1}]  }
   0x1   :  { %21 = vsyncpa [#allocation6], 0 }
   0x2   :  { %22 = vsyncpa [#allocation4], 0  ;;  %s1789_s29 = smov [#allocation2]   ;;  %s1717_s17 = scalar_lea.hbm %s2055_s6, 4096 }
   0x3   :  { %s40_s30 = sshll.u32 %s1789_s29, 4  ;;  %p1718_p0 = scmp.ne.s32.totalorder %s2055_s6, %s1717_s17  ;;  %s41_s30 = int_to_ptr.vmem [resolvable:$true] %s40_s30 }
   0x4   :  { %p1721_p1 = scmp.lt.u32.totalorder %s1717_s17, %s2055_s6 }
   0x6   :  { %p1723_p2 = pnand %p1721_p1, %p1718_p0 }
   0x8   :  { %1726 = shalt.err (!%p1723_p2)
}
   0x9   :  { %s1727_s22 = scalar_lea.vmem %s41_s30, 4096  ;;  %p1732_p4 = scmp.lt.s32.totalorder %s41_s30, %s41_s30 }
   0xa   :  { %p1728_p3 = scmp.ne.s32.totalorder %s41_s30, %s1727_s22  ;;  %p1733_p5 = scmp.lt.s32.totalorder %s1727_s22, %s1727_s22 }
   0xc   :  { %p1734_p6 = por %p1733_p5, %p1732_p4 }
   0xe   :  { %p1735_p7 = pnand %p1734_p6, %p1728_p3 }
  0x10   :  { %1738 = shalt.err (!%p1735_p7)
}
  0x11   :  { %s1790_s23 = smov 64   ;;  %s1791_s24 = smov 4  }
  0x12   :  { %46 = dma.hbm_to_vmem [thread:$0]  %s2055_s6, 4096, %s41_s30, [#allocation3], %s1790_s23, %s1790_s23, %s1791_s24  }
  0x13   :  { %s1792_s27 = smov [#allocation5]   ;;  %s1739_s16 = scalar_lea.hbm %s2060_s11, 4096 }
  0x14   :  { %s60_s28 = sshll.u32 %s1792_s27, 4  ;;  %p1740_p8 = scmp.ne.s32.totalorder %s2060_s11, %s1739_s16  ;;  %s61_s28 = int_to_ptr.vmem [resolvable:$true] %s60_s28 }
  0x15   :  { %p1743_p9 = scmp.lt.u32.totalorder %s1739_s16, %s2060_s11 }
  0x17   :  { %p1745_p10 = pnand %p1743_p9, %p1740_p8 }
  0x19   :  { %1748 = shalt.err (!%p1745_p10)
}
  0x1a   :  { %s1749_s21 = scalar_lea.vmem %s61_s28, 4096  ;;  %p1754_p12 = scmp.lt.s32.totalorder %s61_s28, %s61_s28 }
  0x1b   :  { %p1750_p11 = scmp.ne.s32.totalorder %s61_s28, %s1749_s21  ;;  %p1755_p13 = scmp.lt.s32.totalorder %s1749_s21, %s1749_s21 }
  0x1d   :  { %p1756_p0 = por %p1755_p13, %p1754_p12 }
  0x1f   :  { %p1757_p1 = pnand %p1756_p0, %p1750_p11 }
  0x21   :  { %1760 = shalt.err (!%p1757_p1)
}
  0x22   :  { %66 = dma.hbm_to_vmem [thread:$0]  %s2060_s11, 4096, %s61_s28, [#allocation6], %s1790_s23, %s1790_s23, %s1791_s24  }
  0x23   :  { %1783 = dma.done.wait [#allocation3], 4096  }
  0x24   :  { %1784 = vsyncadd [#allocation3], 4294963200 }
  0x25   :  { %1785 = dma.done.wait [#allocation6], 4096  }
  0x26   :  { %1786 = vsyncadd [#allocation6], 4294963200  ;;  %v1793_v0 = vmov 0   ;;  %v88_v1 = vld [vmem:[%s2053_s4] sm:$0xff]  ;;  %vm104_vm0 = vcmask 1043456   ;;  %v89_v2 = vld [vmem:[%s2053_s4 + $0x8] sm:$0xff]  ;;  %v327_v53 = vlaneseq }
  0x27   :  { %149 = vmatprep.mubr.bf16.mxu0 %v1793_v0  ;;  %190 = vmatprep.mubr.bf16.mxu1 %v1793_v0  ;;  %v78_v3 = vld [vmem:[%s2050_s1] sm:$0xff]  ;;  %v1398_v4 = vcombine.high %v88_v1, %v88_v1  ;;  %v1400_v5 = vcombine.high %v89_v2, %v89_v2  ;;  %v1397_v6 = vcombine.low %v88_v1, %v88_v1  ;;  %v1612_v13 = vld [vmem:[%s2052_s3 + $0xc] ss:$16 sps:$4 sm:$0xff]   ;;  %vm100_vm1 = vcmask 64512   ;;  %v1610_v14 = vld [vmem:[%s2052_s3 + $0x8] ss:$16 sps:$4 sm:$0xff]  }
  0x28   :  { %v1399_v7 = vcombine.low %v89_v2, %v89_v2  ;;  %v1609_v8 = vld [vmem:[%s2052_s3 + $0x4] ss:$16 sps:$4 sm:$0xff]   ;;  %v1916_v11 = vpack.c.bf16 %v78_v3, %v78_v3  ;;  %v1607_v12 = vld [vmem:[%s2052_s3] ss:$16 sps:$4 sm:$0xff]   ;;  %v1616_v17 = vld [vmem:[%s2052_s3 + $0x28] ss:$16 sps:$4 sm:$0xff]  }
  0x29   :  { %1401 = vmatprep.subr.msk.bf16.mxu0 %vm104_vm0, %v1398_v4  ;;  %1403 = vmatprep.subr.msk.bf16.mxu1 %vm104_vm0, %v1400_v5  ;;  %v106_v9 = vsel %vm104_vm0, %v1397_v6, 0  ;;  %v1615_v15 = vld [vmem:[%s2052_s3 + $0x24] ss:$16 sps:$4 sm:$0xff]   ;;  %v1613_v16 = vld [vmem:[%s2052_s3 + $0x20] ss:$16 sps:$4 sm:$0xff]   ;;  %vm239_vm2 = vcmask 261120  }
  0x2a   :  { %v112_v10 = vsel %vm104_vm0, %v1399_v7, 0  ;;  %118 = vmatpush1.bf16.msra.mxu0 %v106_v9  ;;  %v1618_v18 = vld [vmem:[%s2052_s3 + $0x2c] ss:$16 sps:$4 sm:$0xff]   ;;  %v76_v19 = vld [vmem:[%s2049_s0] sm:$0xff]  ;;  %v1627_v29 = vld [vmem:[#allocation2 + $0x50] sm:$0xff]   ;;  %v1948_v54 = vshrl.u32 %v327_v53, 7 }
  0x2b   :  { %159 = vmatpush1.bf16.msra.mxu1 %v112_v10  ;;  %243 = vmatprep.subr.bf16.mxu0 %v1609_v8  ;;  %v77_v20 = vpack.c.bf16 %v76_v19, %v76_v19  ;;  %v1619_v21 = vld [vmem:[#allocation2 + $0x40] sm:$0xff]   ;;  %v1623_v25 = vld [vmem:[#allocation2 + $0x48] sm:$0xff]   ;;  %v1628_v30 = vld [vmem:[#allocation2 + $0xd0] sm:$0xff]   ;;  %vm880_vm7 = vcmask 1041408   ;;  %vm876_vm8 = vcmask 162816   ;;  %s1794_s29 = smov [#allocation7]  }
  0x2c   :  { %284 = vmatprep.subr.bf16.mxu1 %v1612_v13  ;;  %v1620_v22 = vld [vmem:[#allocation2 + $0xc0] sm:$0xff]   ;;  %v1624_v26 = vld [vmem:[#allocation2 + $0xc8] sm:$0xff]   ;;  %v1629_v31 = vld [vmem:[#allocation2 + $0x10] sm:$0xff]   ;;  %v329_v63 = vsub.s32 0, %v1948_v54  ;;  %v337_v1 = vsub.s32 2, %v1948_v54  ;;  %v333_v3 = vsub.s32 1, %v1948_v54 }
  0x2d   :  { %1402 = vmatmul.mubr.msk.bf16.vlgmr.msra.gmra.mrb[0].mxu0 %vm100_vm1, %v1916_v11  ;;  %v1621_v23 = vld [vmem:[#allocation2] sm:$0xff]   ;;  %v1625_v27 = vld [vmem:[#allocation2 + $0x8] sm:$0xff]   ;;  %v1630_v32 = vld [vmem:[#allocation2 + $0x90] sm:$0xff]   ;;  %v341_v4 = vsub.s32 3, %v1948_v54  ;;  %s1383_s0 = sshll.u32 %s1794_s29, 4  ;;  %s1384_s0 = int_to_ptr.vmem [resolvable:$true] %s1383_s0 }
  0x2e   :  { %1404 = vmatmul.mubr.msk.bf16.vlgmr.msra.gmra.mrb[0].mxu1 %vm100_vm1, %v1916_v11  ;;  %244 = vmatpush1.bf16.msra.mxu0 %v1607_v12  ;;  %v1622_v24 = vld [vmem:[#allocation2 + $0x80] sm:$0xff]   ;;  %v1626_v28 = vld [vmem:[#allocation2 + $0x88] sm:$0xff]   ;;  %v1631_v33 = vld [vmem:[#allocation2 + $0x58] sm:$0xff]   ;;  %p1766_p3 = scmp.lt.s32.totalorder %s1384_s0, %s1384_s0 }
  0x2f   :  { %285 = vmatpush1.bf16.msra.mxu1 %v1610_v14  ;;  %245 = vmatprep.subr.bf16.mxu0 %v1615_v15  ;;  %v1632_v34 = vld [vmem:[#allocation2 + $0xd8] sm:$0xff]   ;;  %v1635_v37 = vld [vmem:[#allocation2 + $0x60] sm:$0xff]   ;;  %v1639_v41 = vld [vmem:[#allocation2 + $0x68] sm:$0xff]  }
  0x30   :  { %286 = vmatprep.subr.bf16.mxu1 %v1618_v18  ;;  %275 = vmatprep.mubr.bf16.mxu0 %v1793_v0  ;;  %v1633_v35 = vld [vmem:[#allocation2 + $0x18] sm:$0xff]   ;;  %v1636_v38 = vld [vmem:[#allocation2 + $0xe0] sm:$0xff]   ;;  %v1640_v42 = vld [vmem:[#allocation2 + $0xe8] sm:$0xff]  }
  0x31   :  { %316 = vmatprep.mubr.bf16.mxu1 %v1793_v0  ;;  %v1634_v36 = vld [vmem:[#allocation2 + $0x98] sm:$0xff]   ;;  %v1637_v39 = vld [vmem:[#allocation2 + $0x20] sm:$0xff]   ;;  %v1641_v43 = vld [vmem:[#allocation2 + $0x28] sm:$0xff]  }
  0x32   :  { %246 = vmatpush1.bf16.msra.mxu0 %v1613_v16  ;;  %v1638_v40 = vld [vmem:[#allocation2 + $0xa0] sm:$0xff]   ;;  %v1642_v44 = vld [vmem:[#allocation2 + $0xa8] sm:$0xff]   ;;  %v1643_v45 = vld [vmem:[#allocation2 + $0x70] sm:$0xff]  }
  0x33   :  { %287 = vmatpush1.bf16.msra.mxu1 %v1616_v17  ;;  %1509 = vmatprep.subr.bf16.mxu0 %v1619_v21  ;;  %v1644_v46 = vld [vmem:[#allocation2 + $0xf0] sm:$0xff]   ;;  %v1647_v49 = vld [vmem:[#allocation2 + $0x78] sm:$0xff]   ;;  %v325_v2 = vld [vmem:[%s2054_s5] sm:$0xf] }
  0x34   :  { %1531 = vmatprep.subr.bf16.mxu1 %v1620_v22  ;;  %v1645_v47 = vld [vmem:[#allocation2 + $0x30] sm:$0xff]   ;;  %v1648_v50 = vld [vmem:[#allocation2 + $0xf8] sm:$0xff]   ;;  %v330_v5 = vrot.slane %v325_v2, %v329_v63  ;;  %v338_v6 = vrot.slane %v325_v2, %v337_v1  ;;  %v334_v9 = vrot.slane %v325_v2, %v333_v3  ;;  %v342_v10 = vrot.slane %v325_v2, %v341_v4 }
  0x35   :  { %1413 = vmatmul.mubr.msk.bf16.vlgmr.msra.gmra.mrb[4].mxu0 %vm239_vm2, %v77_v20  ;;  %v1646_v48 = vld [vmem:[#allocation2 + $0xb0] sm:$0xff]   ;;  %v1649_v51 = vld [vmem:[#allocation2 + $0x38] sm:$0xff]  }
  0x36   :  { %1414 = vmatmul.mubr.msk.bf16.vlgmr.msra.gmra.mrb[4].mxu1 %vm239_vm2, %v77_v20  ;;  %1510 = vmatpush3.bf16.msra.mxu0 %v1621_v23  ;;  %v1650_v52 = vld [vmem:[#allocation2 + $0xb8] sm:$0xff]  }
  0x37   :  { %1532 = vmatpush3.bf16.msra.mxu1 %v1622_v24  ;;  %1511 = vmatprep.subr.bf16.mxu0 %v1623_v25 }
  0x38   :  { %1533 = vmatprep.subr.bf16.mxu1 %v1624_v26 }
  0x3a   :  { %1512 = vmatpush3.bf16.msra.mxu0 %v1625_v27 }
  0x3b   :  { %1534 = vmatpush3.bf16.msra.mxu1 %v1626_v28  ;;  %1513 = vmatprep.subr.bf16.mxu0 %v1627_v29 }
  0x3c   :  { %1535 = vmatprep.subr.bf16.mxu1 %v1628_v30 }
  0x3e   :  { %1514 = vmatpush3.bf16.msra.mxu0 %v1629_v31 }
  0x3f   :  { %1536 = vmatpush3.bf16.msra.mxu1 %v1630_v32  ;;  %1515 = vmatprep.subr.bf16.mxu0 %v1631_v33 }
  0x40   :  { %1537 = vmatprep.subr.bf16.mxu1 %v1632_v34 }
  0x42   :  { %1516 = vmatpush3.bf16.msra.mxu0 %v1633_v35 }
  0x43   :  { %1538 = vmatpush3.bf16.msra.mxu1 %v1634_v36  ;;  %1517 = vmatprep.subr.bf16.mxu0 %v1635_v37 }
  0x44   :  { %1539 = vmatprep.subr.bf16.mxu1 %v1636_v38 }
  0x46   :  { %1518 = vmatpush3.bf16.msra.mxu0 %v1637_v39 }
  0x47   :  { %1540 = vmatpush3.bf16.msra.mxu1 %v1638_v40  ;;  %1519 = vmatprep.subr.bf16.mxu0 %v1639_v41 }
  0x48   :  { %1541 = vmatprep.subr.bf16.mxu1 %v1640_v42 }
  0x4a   :  { %1520 = vmatpush3.bf16.msra.mxu0 %v1641_v43 }
  0x4b   :  { %1542 = vmatpush3.bf16.msra.mxu1 %v1642_v44  ;;  %1521 = vmatprep.subr.bf16.mxu0 %v1643_v45 }
  0x4c   :  { %1543 = vmatprep.subr.bf16.mxu1 %v1644_v46 }
  0x4e   :  { %1522 = vmatpush3.bf16.msra.mxu0 %v1645_v47 }
  0x4f   :  { %1544 = vmatpush3.bf16.msra.mxu1 %v1646_v48  ;;  %1523 = vmatprep.subr.bf16.mxu0 %v1647_v49 }
  0x50   :  { %1545 = vmatprep.subr.bf16.mxu1 %v1648_v50  ;;  %v740_v50 = vld [vmem:[%s2058_s9] sm:$0xff] }
  0x51   :  { %v1452_v53 = vcombine.low %v740_v50, %v740_v50 }
  0x52   :  { %1524 = vmatpush3.bf16.msra.mxu0 %v1649_v51  ;;  %v741_v51 = vld [vmem:[%s2058_s9 + $0x8] sm:$0xff] }
  0x53   :  { %1546 = vmatpush3.bf16.msra.mxu1 %v1650_v52  ;;  %v1453_v52 = vcombine.high %v740_v50, %v740_v50  ;;  %v1675_v50 = vld [vmem:[#allocation5 + $0x10] sm:$0xff]  }
  0x55   :  { %1456 = vmatprep.subr.msk.bf16.mxu0 %vm104_vm0, %v1453_v52  ;;  %v1677_v52 = vld [vmem:[#allocation5 + $0x58] sm:$0xff]  }
 0x100   :  { %v151_v55 = vpop.f32.mrb[0].mxu0 }
 0x101   :  { %v192_v56 = vpop.f32.mrb[0].mxu1  ;;  %v153_v57 = vpop.f32.mrb[1].mxu0 }
 0x102   :  { %v194_v58 = vpop.f32.mrb[1].mxu1  ;;  %v155_v59 = vpop.f32.mrb[2].mxu0 }
 0x103   :  { %v196_v60 = vpop.f32.mrb[2].mxu1  ;;  %v156_v61 = vpop.f32.mrb[3].mxu0  ;;  %v753_v59 = vsel %vm104_vm0, %v1452_v53, 0  ;;  %v1678_v53 = vld [vmem:[#allocation5 + $0xd8] sm:$0xff]  }
 0x104   :  { %v197_v62 = vpop.f32.mrb[3].mxu1  ;;  %v1655_v61 = vld [vmem:[%s2057_s8] ss:$16 sps:$4 sm:$0xff]  }
 0x105   :  { %v1658_v62 = vld [vmem:[%s2057_s8 + $0x8] ss:$16 sps:$4 sm:$0xff]  }
 0x108   :  { %v277_v7 = vpop.f32.mrb[4].mxu0 }
 0x109   :  { %v318_v8 = vpop.f32.mrb[4].mxu1  ;;  %v278_v12 = vadd.f32 %v277_v7, %v151_v55  ;;  %v279_v14 = vpop.f32.mrb[5].mxu0  ;;  %v1455_v55 = vcombine.high %v741_v51, %v741_v51 }
 0x10a   :  { %v319_v13 = vadd.f32 %v318_v8, %v192_v56  ;;  %v320_v15 = vpop.f32.mrb[5].mxu1  ;;  %v280_v16 = vadd.f32 %v279_v14, %v153_v57  ;;  %v281_v18 = vpop.f32.mrb[6].mxu0  ;;  %v1454_v56 = vcombine.low %v741_v51, %v741_v51  ;;  %v1657_v57 = vld [vmem:[%s2057_s8 + $0x4] ss:$16 sps:$4 sm:$0xff]  }
 0x10b   :  { %v321_v17 = vadd.f32 %v320_v15, %v194_v58  ;;  %v322_v19 = vpop.f32.mrb[6].mxu1  ;;  %v347_v20 = vadd.f32 %v330_v5, %v278_v12  ;;  %v282_v22 = vpop.f32.mrb[7].mxu0  ;;  %v1660_v58 = vld [vmem:[%s2057_s8 + $0xc] ss:$16 sps:$4 sm:$0xff]   ;;  %1458 = vmatprep.subr.msk.bf16.mxu1 %vm104_vm0, %v1455_v55  ;;  %v738_v18 = vld [vmem:[%s2057_s8 + $0x20] sm:$0x33] }
 0x10c   :  { %v349_v21 = vadd.f32 %v338_v6, %v319_v13  ;;  %v323_v23 = vpop.f32.mrb[7].mxu1  ;;  %v348_v24 = vadd.f32 %v334_v9, %v280_v16  ;;  %v759_v60 = vsel %vm104_vm0, %v1454_v56, 0  ;;  %v1419_v6 = vld [vmem:[%s2056_s7] ss:$0 sm:$0xff]  ;;  %v739_v19 = vld [vmem:[%s2057_s8 + $0x28] sm:$0x33]  ;;  %v1464_v22 = vcombine.low %v738_v18, %v738_v18 }
 0x10d   :  { %v350_v25 = vadd.f32 %v342_v10, %v321_v17  ;;  %v355_v26 = vmin.f32 %v347_v20, 0.0  ;;  %vm351_vm3 = vcmp.gt.f32.partialorder %v347_v20, 0.0  ;;  %v1466_v23 = vcombine.low %v739_v19, %v739_v19  ;;  %v1676_v51 = vld [vmem:[#allocation5 + $0x90] sm:$0xff]   ;;  %v1679_v55 = vld [vmem:[#allocation5 + $0x18] sm:$0xff]  }
 0x10e   :  { %v357_v27 = vmin.f32 %v349_v21, 0.0  ;;  %v356_v28 = vmin.f32 %v348_v24, 0.0  ;;  %vm353_vm4 = vcmp.gt.f32.partialorder %v349_v21, 0.0  ;;  %vm352_vm5 = vcmp.gt.f32.partialorder %v348_v24, 0.0  ;;  %v1680_v56 = vld [vmem:[#allocation5 + $0x98] sm:$0xff]  }
 0x10f   :  { %v358_v29 = vmin.f32 %v350_v25, 0.0  ;;  %v359_v30 = vmul.f32 1.442695, %v355_v26  ;;  %vm354_vm6 = vcmp.gt.f32.partialorder %v350_v25, 0.0  ;;  %v1665_v26 = vld [vmem:[#allocation5 + $0x40] sm:$0xff]  }
 0x110   :  { %v363_v31 = vmul.f32 1.442695, %v357_v27  ;;  %v361_v32 = vmul.f32 1.442695, %v356_v28  ;;  %v1666_v27 = vld [vmem:[#allocation5 + $0xc0] sm:$0xff]  }
 0x111   :  { %v365_v33 = vmul.f32 1.442695, %v358_v29  ;;  %1697 = vpow2.f32 %v359_v30 }
 0x112   :  { %1699 = vpow2.f32 %v363_v31 }
 0x113   :  { %1701 = vpow2.f32 %v361_v32 }
 0x114   :  { %1703 = vpow2.f32 %v365_v33 }
 0x11b   :  { %v1698_v34 = vpop.eup %1697 }
 0x11c   :  { %v1700_v35 = vpop.eup %1699  ;;  %v1415_v36 = vadd.f32 -1.0, %v1698_v34 }
 0x11d   :  { %v1702_v37 = vpop.eup %1701  ;;  %v1417_v38 = vadd.f32 -1.0, %v1700_v35 }
 0x11e   :  { %v1704_v39 = vpop.eup %1703  ;;  %v1416_v40 = vadd.f32 -1.0, %v1702_v37  ;;  %v371_v41 = vsel %vm351_vm3, %v347_v20, %v1415_v36  ;;  %v1465_v20 = vcombine.high %v738_v18, %v738_v18  ;;  %v723_v37 = vld [vmem:[%s2051_s2] sm:$0xff] }
 0x11f   :  { %v1418_v42 = vadd.f32 -1.0, %v1704_v39  ;;  %v373_v43 = vsel %vm353_vm4, %v349_v21, %v1417_v38  ;;  %v375_v47 = vpack.c.bf16 %v371_v41, %v371_v41  ;;  %v1467_v21 = vcombine.high %v739_v19, %v739_v19  ;;  %v1667_v41 = vld [vmem:[#allocation5] sm:$0xff]  }
 0x120   :  { %v372_v44 = vsel %vm352_vm5, %v348_v24, %v1416_v40  ;;  %v377_v49 = vpack.c.bf16 %v373_v43, %v373_v43  ;;  %v882_v24 = vsel %vm880_vm7, %v1464_v22, 0 }
 0x121   :  { %v376_v45 = vpack.c.bf16 %v372_v44, %v372_v44  ;;  %v374_v46 = vsel %vm354_vm6, %v350_v25, %v1418_v42  ;;  %v888_v25 = vsel %vm880_vm7, %v1466_v23, 0  ;;  %v1668_v42 = vld [vmem:[#allocation5 + $0x80] sm:$0xff]   ;;  %v1669_v44 = vld [vmem:[#allocation5 + $0x48] sm:$0xff]  }
 0x122   :  { %v378_v48 = vpack.c.bf16 %v374_v46, %v374_v46  ;;  %v1671_v46 = vld [vmem:[#allocation5 + $0x8] sm:$0xff]  }
 0x123   :  { %674 = vmatprep.mubr.bf16.mxu0 %v376_v45  ;;  %v1670_v45 = vld [vmem:[#allocation5 + $0xc8] sm:$0xff]  }
 0x124   :  { %714 = vmatprep.mubr.bf16.mxu1 %v378_v48  ;;  %675 = vmatmul.mubr.bf16.vlgmr.msra.gmra.mrb[8].mxu0 %v375_v47  ;;  %v1672_v47 = vld [vmem:[#allocation5 + $0x88] sm:$0xff]   ;;  %v1673_v48 = vld [vmem:[#allocation5 + $0x50] sm:$0xff]  }
 0x125   :  { %715 = vmatmul.mubr.bf16.vlgmr.msra.gmra.mrb[8].mxu1 %v377_v49  ;;  %796 = vmatprep.mubr.bf16.mxu0 %v1793_v0  ;;  %v1674_v49 = vld [vmem:[#allocation5 + $0xd0] sm:$0xff]  }
 0x126   :  { %837 = vmatprep.mubr.bf16.mxu1 %v1793_v0  ;;  %765 = vmatpush1.bf16.msra.mxu0 %v753_v59  ;;  %v1683_v59 = vld [vmem:[#allocation5 + $0x20] sm:$0xff]  }
 0x127   :  { %806 = vmatpush1.bf16.msra.mxu1 %v759_v60  ;;  %893 = vmatprep.subr.bf16.mxu0 %v1657_v57  ;;  %v1681_v57 = vld [vmem:[#allocation5 + $0x60] sm:$0xff]  }
 0x128   :  { %934 = vmatprep.subr.bf16.mxu1 %v1660_v58  ;;  %v1682_v58 = vld [vmem:[#allocation5 + $0xe0] sm:$0xff]  }
 0x129   :  { %v1684_v60 = vld [vmem:[#allocation5 + $0xa0] sm:$0xff]  }
 0x12c   :  { %1457 = vmatmul.mubr.msk.bf16.vlgmr.msra.gmra.mrb[12].mxu0 %vm100_vm1, %v1916_v11 }
 0x12d   :  { %1459 = vmatmul.mubr.msk.bf16.vlgmr.msra.gmra.mrb[12].mxu1 %vm100_vm1, %v1916_v11  ;;  %894 = vmatpush1.bf16.msra.mxu0 %v1655_v61  ;;  %v1685_v61 = vld [vmem:[#allocation5 + $0x68] sm:$0xff]  }
 0x12e   :  { %935 = vmatpush1.bf16.msra.mxu1 %v1658_v62  ;;  %925 = vmatprep.mubr.bf16.mxu0 %v1793_v0  ;;  %v1686_v62 = vld [vmem:[#allocation5 + $0xe8] sm:$0xff]  }
 0x12f   :  { %966 = vmatprep.mubr.bf16.mxu1 %v1793_v0  ;;  %1468 = vmatprep.subr.msk.bf16.mxu0 %vm880_vm7, %v1465_v20 }
 0x130   :  { %1470 = vmatprep.subr.msk.bf16.mxu1 %vm880_vm7, %v1467_v21 }
 0x131   :  { %896 = vmatpush1.bf16.msra.mxu0 %v882_v24 }
 0x132   :  { %937 = vmatpush1.bf16.msra.mxu1 %v888_v25  ;;  %1553 = vmatprep.subr.bf16.mxu0 %v1665_v26 }
 0x133   :  { %1575 = vmatprep.subr.bf16.mxu1 %v1666_v27 }
 0x1f7   :  { %v1525_v2 = vpop.f32.mrb[8].mxu0 }
 0x1f8   :  { %v1547_v5 = vpop.f32.mrb[8].mxu1  ;;  %v1526_v7 = vpop.f32.mrb[9].mxu0 }
 0x1f9   :  { %v1527_v8 = vadd.f32 %v1526_v7, %v1525_v2  ;;  %v1548_v9 = vpop.f32.mrb[9].mxu1  ;;  %v1528_v10 = vpop.f32.mrb[10].mxu0  ;;  %v1687_v2 = vld [vmem:[#allocation5 + $0x28] sm:$0xff]   ;;  %v1690_v7 = vld [vmem:[#allocation5 + $0xf0] sm:$0xff]  }
 0x1fa   :  { %v1549_v12 = vadd.f32 %v1548_v9, %v1547_v5  ;;  %v1550_v13 = vpop.f32.mrb[10].mxu1  ;;  %v1529_v14 = vpop.f32.mrb[11].mxu0  ;;  %v1688_v5 = vld [vmem:[#allocation5 + $0xa8] sm:$0xff]   ;;  %v1692_v9 = vld [vmem:[#allocation5 + $0xb0] sm:$0xff]   ;;  %v1693_v10 = vld [vmem:[#allocation5 + $0x78] sm:$0xff]  }
 0x1fb   :  { %v677_v11 = vadd.f32 %v1527_v8, %v1419_v6  ;;  %v1551_v15 = vpop.f32.mrb[11].mxu1  ;;  %v1689_v6 = vld [vmem:[#allocation5 + $0x70] sm:$0xff]   ;;  %v1695_v13 = vld [vmem:[#allocation5 + $0x38] sm:$0xff]  }
 0x1fc   :  { %v1691_v8 = vld [vmem:[#allocation5 + $0x30] sm:$0xff]   ;;  %v1696_v14 = vld [vmem:[#allocation5 + $0xb8] sm:$0xff]  }
 0x1fd   :  { %v717_v16 = vadd.f32 %v1549_v12, %v677_v11  ;;  %v1694_v12 = vld [vmem:[#allocation5 + $0xf8] sm:$0xff]   ;;  %v975_v11 = vld [vmem:[%s2059_s10] sm:$0xf] }
 0x1fe   :  { %v980_v15 = vrot.slane %v975_v11, %v329_v63  ;;  %v984_v18 = vrot.slane %v975_v11, %v333_v3  ;;  %v992_v19 = vrot.slane %v975_v11, %v341_v4 }
 0x1ff   :  { %722 = vst [vmem:[%s2063_s14] sm:$0xff] %v717_v16  ;;  %v724_v0 = vmul.f32 0.5, %v717_v16  ;;  %v2008_v29 = vpop.f32.mrb[12].mxu0 }
 0x200   :  { %v2010_v30 = vpop.f32.mrb[12].mxu1  ;;  %v2012_v31 = vpop.f32.mrb[13].mxu0 }
 0x201   :  { %v725_v17 = vmul.f32 1.442695, %v724_v0  ;;  %v2014_v32 = vpop.f32.mrb[13].mxu1  ;;  %v802_v33 = vpop.f32.mrb[14].mxu0 }
 0x202   :  { %v843_v34 = vpop.f32.mrb[14].mxu1  ;;  %v803_v35 = vpop.f32.mrb[15].mxu0 }
 0x203   :  { %1705 = vpow2.f32 %v725_v17  ;;  %v844_v36 = vpop.f32.mrb[15].mxu1 }
 0x20d   :  { %v1706_v28 = vpop.eup %1705 }
 0x20e   :  { %728 = vrot.lane.b32.xlu0 %v1706_v28, %s1790_s23 }
 0x280   :  { %v729_v38 = vpop.permute.xlu0 %728 }
 0x281   :  { %v731_v39 = vmul.f32 %v729_v38, %v723_v37 }
 0x283   :  { %v732_v40 = vadd.f32 %v731_v39, %v717_v16  ;;  %v988_v16 = vrot.slane %v975_v11, %v337_v1 }
 0x285   :  { %v733_v43 = vpack.c.bf16 %v732_v40, %v732_v40 }
 0x287   :  { %1469 = vmatmul.mubr.msk.bf16.vlgmr.msra.gmra.mrb[16].mxu0 %vm876_vm8, %v733_v43  ;;  %1471 = vmatmul.mubr.msk.bf16.vlgmr.msra.gmra.mrb[16].mxu1 %vm876_vm8, %v733_v43 }
 0x288   :  { %1554 = vmatpush3.bf16.msra.mxu0 %v1667_v41  ;;  %1576 = vmatpush3.bf16.msra.mxu1 %v1668_v42 }
 0x289   :  { %1555 = vmatprep.subr.bf16.mxu0 %v1669_v44  ;;  %1577 = vmatprep.subr.bf16.mxu1 %v1670_v45 }
 0x28c   :  { %1556 = vmatpush3.bf16.msra.mxu0 %v1671_v46  ;;  %1578 = vmatpush3.bf16.msra.mxu1 %v1672_v47 }
 0x28d   :  { %1557 = vmatprep.subr.bf16.mxu0 %v1673_v48  ;;  %1579 = vmatprep.subr.bf16.mxu1 %v1674_v49 }
 0x290   :  { %1558 = vmatpush3.bf16.msra.mxu0 %v1675_v50  ;;  %1580 = vmatpush3.bf16.msra.mxu1 %v1676_v51 }
 0x291   :  { %1559 = vmatprep.subr.bf16.mxu0 %v1677_v52  ;;  %1581 = vmatprep.subr.bf16.mxu1 %v1678_v53 }
 0x294   :  { %1560 = vmatpush3.bf16.msra.mxu0 %v1679_v55  ;;  %1582 = vmatpush3.bf16.msra.mxu1 %v1680_v56  ;;  %v1476_v56 = vld [vmem:[%s2061_s12] ss:$0 sm:$0xff]  ;;  %s1761_s12 = scalar_lea.vmem %s1384_s0, 128 }
 0x295   :  { %1561 = vmatprep.subr.bf16.mxu0 %v1681_v57  ;;  %1583 = vmatprep.subr.bf16.mxu1 %v1682_v58  ;;  %p1762_p2 = scmp.ne.s32.totalorder %s1384_s0, %s1761_s12  ;;  %p1767_p4 = scmp.lt.s32.totalorder %s1761_s12, %s1761_s12 }
 0x297   :  { %p1768_p5 = por %p1767_p4, %p1766_p3 }
 0x298   :  { %1562 = vmatpush3.bf16.msra.mxu0 %v1683_v59  ;;  %1584 = vmatpush3.bf16.msra.mxu1 %v1684_v60 }
 0x299   :  { %1563 = vmatprep.subr.bf16.mxu0 %v1685_v61  ;;  %1585 = vmatprep.subr.bf16.mxu1 %v1686_v62  ;;  %p1769_p6 = pnand %p1768_p5, %p1762_p2 }
 0x29c   :  { %1564 = vmatpush3.bf16.msra.mxu0 %v1687_v2  ;;  %1586 = vmatpush3.bf16.msra.mxu1 %v1688_v5 }
 0x29d   :  { %1565 = vmatprep.subr.bf16.mxu0 %v1689_v6  ;;  %1587 = vmatprep.subr.bf16.mxu1 %v1690_v7 }
 0x2a0   :  { %1566 = vmatpush3.bf16.msra.mxu0 %v1691_v8  ;;  %1588 = vmatpush3.bf16.msra.mxu1 %v1692_v9 }
 0x2a1   :  { %1567 = vmatprep.subr.bf16.mxu0 %v1693_v10  ;;  %1589 = vmatprep.subr.bf16.mxu1 %v1694_v12 }
 0x2a4   :  { %1568 = vmatpush3.bf16.msra.mxu0 %v1695_v13  ;;  %1590 = vmatpush3.bf16.msra.mxu1 %v1696_v14 }
 0x35a   :  { %v927_v0 = vpop.f32.mrb[16].mxu0  ;;  %v968_v17 = vpop.f32.mrb[16].mxu1 }
 0x35b   :  { %v928_v20 = vadd.f32 %v927_v0, %v2008_v29  ;;  %v969_v21 = vadd.f32 %v968_v17, %v2010_v30  ;;  %v929_v22 = vpop.f32.mrb[17].mxu0  ;;  %v970_v23 = vpop.f32.mrb[17].mxu1 }
 0x35c   :  { %v930_v24 = vadd.f32 %v929_v22, %v2012_v31  ;;  %v971_v63 = vadd.f32 %v970_v23, %v2014_v32  ;;  %v931_v25 = vpop.f32.mrb[18].mxu0  ;;  %v972_v1 = vpop.f32.mrb[18].mxu1 }
 0x35d   :  { %v997_v26 = vadd.f32 %v980_v15, %v928_v20  ;;  %v999_v27 = vadd.f32 %v988_v16, %v969_v21  ;;  %v932_v28 = vpop.f32.mrb[19].mxu0  ;;  %v973_v33 = vpop.f32.mrb[19].mxu1 }
 0x35e   :  { %v998_v3 = vadd.f32 %v984_v18, %v930_v24  ;;  %v1000_v34 = vadd.f32 %v992_v19, %v971_v63 }
 0x35f   :  { %v1005_v54 = vmin.f32 %v997_v26, 0.0  ;;  %v1007_v4 = vmin.f32 %v999_v27, 0.0  ;;  %vm1001_vm9 = vcmp.gt.f32.partialorder %v997_v26, 0.0  ;;  %vm1003_vm10 = vcmp.gt.f32.partialorder %v999_v27, 0.0 }
 0x360   :  { %v1006_v35 = vmin.f32 %v998_v3, 0.0  ;;  %v1008_v29 = vmin.f32 %v1000_v34, 0.0  ;;  %vm1002_vm11 = vcmp.gt.f32.partialorder %v998_v3, 0.0  ;;  %vm1004_vm12 = vcmp.gt.f32.partialorder %v1000_v34, 0.0 }
 0x361   :  { %v1009_v36 = vmul.f32 1.442695, %v1005_v54  ;;  %v1013_v30 = vmul.f32 1.442695, %v1007_v4 }
 0x362   :  { %v1011_v37 = vmul.f32 1.442695, %v1006_v35  ;;  %v1015_v38 = vmul.f32 1.442695, %v1008_v29 }
 0x363   :  { %1707 = vpow2.f32 %v1009_v36 }
 0x364   :  { %1709 = vpow2.f32 %v1013_v30 }
 0x365   :  { %1711 = vpow2.f32 %v1011_v37 }
 0x366   :  { %1713 = vpow2.f32 %v1015_v38 }
 0x36d   :  { %v1708_v31 = vpop.eup %1707 }
 0x36e   :  { %v1710_v32 = vpop.eup %1709  ;;  %v1472_v39 = vadd.f32 -1.0, %v1708_v31 }
 0x36f   :  { %v1712_v40 = vpop.eup %1711  ;;  %v1474_v41 = vadd.f32 -1.0, %v1710_v32 }
 0x370   :  { %v1714_v42 = vpop.eup %1713  ;;  %v1473_v43 = vadd.f32 -1.0, %v1712_v40  ;;  %v1021_v44 = vsel %vm1001_vm9, %v997_v26, %v1472_v39 }
 0x371   :  { %v1475_v45 = vadd.f32 -1.0, %v1714_v42  ;;  %v1023_v46 = vsel %vm1003_vm10, %v999_v27, %v1474_v41  ;;  %v1025_v50 = vpack.c.bf16 %v1021_v44, %v1021_v44 }
 0x372   :  { %v1022_v47 = vsel %vm1002_vm11, %v998_v3, %v1473_v43  ;;  %v1027_v52 = vpack.c.bf16 %v1023_v46, %v1023_v46 }
 0x373   :  { %v1026_v48 = vpack.c.bf16 %v1022_v47, %v1022_v47  ;;  %v1024_v49 = vsel %vm1004_vm12, %v1000_v34, %v1475_v45 }
 0x374   :  { %v1028_v51 = vpack.c.bf16 %v1024_v49, %v1024_v49 }
 0x375   :  { %1324 = vmatprep.mubr.bf16.mxu0 %v1026_v48 }
 0x376   :  { %1364 = vmatprep.mubr.bf16.mxu1 %v1028_v51  ;;  %1325 = vmatmul.mubr.bf16.vlgmr.msra.gmra.mrb[20].mxu0 %v1025_v50 }
 0x377   :  { %1365 = vmatmul.mubr.bf16.vlgmr.msra.gmra.mrb[20].mxu1 %v1027_v52 }
 0x449   :  { %v1569_v53 = vpop.f32.mrb[20].mxu0 }
 0x44a   :  { %v1591_v55 = vpop.f32.mrb[20].mxu1  ;;  %v1570_v57 = vpop.f32.mrb[21].mxu0 }
 0x44b   :  { %v1571_v58 = vadd.f32 %v1570_v57, %v1569_v53  ;;  %v1592_v59 = vpop.f32.mrb[21].mxu1  ;;  %v1572_v60 = vpop.f32.mrb[22].mxu0 }
 0x44c   :  { %v1593_v61 = vadd.f32 %v1592_v59, %v1591_v55  ;;  %v1594_v62 = vpop.f32.mrb[22].mxu1  ;;  %v1573_v2 = vpop.f32.mrb[23].mxu0 }
 0x44d   :  { %v1327_v5 = vadd.f32 %v1571_v58, %v1476_v56  ;;  %v1595_v6 = vpop.f32.mrb[23].mxu1 }
 0x44f   :  { %v1367_v7 = vadd.f32 %v1593_v61, %v1327_v5 }
 0x451   :  { %v1372_v8 = vmul.f32 0.5, %v1367_v7 }
 0x453   :  { %1715 = vtanh.f32 %v1372_v8 }
 0x45d   :  { %v1716_v9 = vpop.eup %1715 }
 0x45e   :  { %v1374_v10 = vmul.f32 0.5, %v1716_v9 }
 0x460   :  { %v1375_v12 = vadd.f32 0.5, %v1374_v10 }
 0x462   :  { %1376 = vst [vmem:[#allocation7] sm:$0xff] %v1375_v12 }
 0x463   :  { %1772 = shalt.err (!%p1769_p6)
}
 0x464   :  { %s1773_s11 = scalar_lea.hbm %s2062_s13, 128 }
 0x465   :  { %p1774_p7 = scmp.ne.s32.totalorder %s2062_s13, %s1773_s11  ;;  %p1777_p8 = scmp.lt.u32.totalorder %s1773_s11, %s2062_s13 }
 0x467   :  { %p1779_p9 = pnand %p1777_p8, %p1774_p7 }
 0x469   :  { %1782 = shalt.err (!%p1779_p9)
}
 0x46a   :  { %1386 = dma.vmem_to_hbm [thread:$0]  %s1384_s0, 128, %s2062_s13, [#allocation4]  }
 0x46b   :  { %1787 = dma.done.wait [#allocation4], 128  }
 0x46c   :  { %1788 = vsyncadd [#allocation4], 4294967168 }
 0x46d   :  { %1394 = vsyncpa [#allocation3], 1 }
 0x46e   :  { %1395 = vsyncpa [#allocation6], 1 }
 0x46f   :  { %1396 = vsyncpa [#allocation4], 1 }

</bundles_post_ra>
